<compile_context>
chip_gen: v7x
topology: tpu7x:2x2x1
jax: 0.10.0
libtpu: 0.0.40
codegen_flags: <defaults>
</compile_context>

<pallas_src>
import math

import jax
import jax.numpy as jnp
from jax.experimental import pallas as pl
from jax.experimental.pallas import tpu as pltpu

_ROW_ALIGN = 32              # full (32,128) vreg packing for every dtype
_MAX_STEP_BYTES = 26 << 20   # cap on (in+out) bytes per grid step
_VMEM_CAP_BYTES = 56 << 20   # stay under v7x's 64 MiB/TC physical VMEM
_VMEM_MARGIN_BYTES = 4 << 20 # headroom for compiler scratch / bookkeeping


def _round_up(v: int, m: int) -> int:
    return ((v + m - 1) // m) * m


def _layer_scale_kernel(gamma_ref, x_ref, o_ref):
    # gamma_ref: (1, L) broadcast over the rows of the x tile (pure VPU mul).
    # Promotion (e.g. bf16 x * f32 gamma -> f32) happens in-register; the
    # store casts to the requested output dtype.
    o_ref[...] = (x_ref[...] * gamma_ref[...]).astype(o_ref.dtype)


def _pick_block_rows(num_rows: int, per_row_bytes: int,
                     target_step_bytes: int) -> int:
    """Rows per grid step.

    ~target_step_bytes of (input + output) bytes per step, rows a multiple of
    32, and the grid rounded up to an even count with ~equal blocks so v7x's
    two TensorCores get balanced work (no-op on single-TC v5e/v6e).
    """
    if num_rows <= _ROW_ALIGN:
        return max(num_rows, 1)  # full row extent -> always a legal block
    target = min(target_step_bytes, _MAX_STEP_BYTES)
    budget = max(_ROW_ALIGN,
                 (target // per_row_bytes) // _ROW_ALIGN * _ROW_ALIGN)
    grid = pl.cdiv(num_rows, budget)
    grid = max(2, grid + (grid & 1))                    # even grid for 2 TCs
    balanced = _round_up(pl.cdiv(num_rows, grid), _ROW_ALIGN)
    return int(min(balanced, budget))


def layer_scale(x: jax.Array, gamma: jax.Array, *,
                out_dtype=None,
                target_step_bytes: int = 20 << 20,
                donate_x: bool = False) -> jax.Array:
    """y = x * gamma, gamma broadcast along the last axis of x.

    out_dtype: override the output dtype (default: torch-style promotion of
      x.dtype and gamma.dtype). The multiply itself is still done in the
      promoted dtype; only the stored result is narrowed.
    donate_x: alias the output onto x's buffer. Only saves memory/bandwidth
      if x is actually donated at the jit boundary and x.dtype == out_dtype;
      otherwise XLA adds a defensive copy or the alias silently no-ops.
    """
    orig_shape = x.shape
    dim = orig_shape[-1]
    assert gamma.shape == (dim,), f"gamma shape {gamma.shape} != ({dim},)"

    compute_dtype = jnp.result_type(x.dtype, gamma.dtype)
    out_dtype = jnp.dtype(out_dtype) if out_dtype is not None else compute_dtype

    total = x.size
    if total == 0:  # degenerate empty input: nothing for a kernel to do
        return jnp.zeros(orig_shape, out_dtype)

    # --- Lane-dense 2D layout ----------------------------------------------
    # Fold rows into the lane axis when the flat size divides lcm(dim, 128);
    # otherwise keep lane = dim (full last axis -> still contiguous HBM DMA,
    # legal block shape, just masked lane occupancy in VMEM).
    lane = math.lcm(dim, 128)
    if total % lane == 0:
        num_rows = total // lane
        x2 = x.reshape(num_rows, lane)
        gamma_row = jnp.tile(gamma, lane // dim).reshape(1, lane).astype(compute_dtype)
    else:
        lane = dim
        num_rows = total // dim
        x2 = x.reshape(num_rows, lane)
        gamma_row = gamma.reshape(1, lane).astype(compute_dtype)

    in_itemsize = x2.dtype.itemsize
    out_itemsize = jnp.dtype(out_dtype).itemsize
    per_row_bytes = lane * (in_itemsize + out_itemsize)
    block_rows = _pick_block_rows(num_rows, per_row_bytes, target_step_bytes)
    grid = pl.cdiv(num_rows, block_rows)  # ragged tail handled by masked block

    # VMEM limit derived from the real double-buffered footprint, capped for
    # v7x's 64 MiB/TC (v5e/v6e have 128 MiB so the cap is always safe there).
    in_tile = block_rows * lane * in_itemsize
    out_tile = block_rows * lane * out_itemsize
    gamma_bytes = lane * gamma_row.dtype.itemsize
    footprint = 2 * (in_tile + out_tile + gamma_bytes)
    vmem_limit = int(min(_VMEM_CAP_BYTES, footprint + _VMEM_MARGIN_BYTES))

    cost = pl.CostEstimate(
        flops=int(total),
        transcendentals=0,
        bytes_accessed=int(total * in_itemsize + total * out_itemsize + gamma_bytes),
    )

    extra = {}
    if donate_x and x2.dtype == jnp.dtype(out_dtype):
        # Reuse x's HBM buffer for the output when the caller says x is dead
        # (see docstring: requires real donation at the jit boundary to help).
        extra["input_output_aliases"] = {1: 0}

    out = pl.pallas_call(
        _layer_scale_kernel,
        out_shape=jax.ShapeDtypeStruct((num_rows, lane), out_dtype),
        grid_spec=pltpu.PrefetchScalarGridSpec(
            num_scalar_prefetch=0,
            grid=(grid,),
            in_specs=[
                pl.BlockSpec((1, lane), lambda i: (0, 0)),           # gamma (replicated)
                pl.BlockSpec((block_rows, lane), lambda i: (i, 0)),  # x tile
            ],
            out_specs=pl.BlockSpec((block_rows, lane), lambda i: (i, 0)),
        ),
        compiler_params=pltpu.CompilerParams(
            dimension_semantics=("parallel",),
            vmem_limit_bytes=vmem_limit,
        ),
        cost_estimate=cost,
        **extra,
    )(gamma_row, x2)

    return out.reshape(orig_shape)


if __name__ == "__main__":
    # Deterministic parameters matching nn.Parameter(init_values * ones(dim)).
    batch, seq, dim = 2, 8, 32
    init_values = 1e-5
    gamma = init_values * jnp.ones((dim,), dtype=jnp.float32)

    key = jax.random.PRNGKey(0)
    x = jax.random.normal(key, (batch, seq, dim), dtype=jnp.float32)

    # Case 1: dim=32 (<128) -> lane-dense folded layout (lane = lcm(32,128) = 128).
    y = layer_scale(x, gamma)
    jax.block_until_ready(y)
    y_ref = x * gamma
    assert y.shape == x.shape and y.dtype == y_ref.dtype
    assert jnp.allclose(y, y_ref, rtol=1e-6, atol=1e-6)

    # Case 2: dim multiple of 128 (typical transformer width), balanced 2-block grid.
    dim2 = 256
    gamma_b = init_values * jnp.ones((dim2,), dtype=jnp.float32)
    x_b = jax.random.normal(jax.random.PRNGKey(0), (4, 16, dim2), dtype=jnp.float32)
    y_b = layer_scale(x_b, gamma_b)
    jax.block_until_ready(y_b)
    assert jnp.allclose(y_b, x_b * gamma_b, rtol=1e-6, atol=1e-6)

    # Case 3: ragged fallback (total not divisible by lcm(dim,128)); blocks
    # still span the full last dim so HBM DMA stays contiguous.
    dim3 = 96
    gamma_c = init_values * jnp.ones((dim3,), dtype=jnp.float32)
    x_c = jax.random.normal(jax.random.PRNGKey(0), (3, 5, dim3), dtype=jnp.float32)
    y_c = layer_scale(x_c, gamma_c)
    jax.block_until_ready(y_c)
    assert jnp.allclose(y_c, x_c * gamma_c, rtol=1e-6, atol=1e-6)

    # Case 4: bf16 activations + f32 gamma with the out_dtype escape hatch
    # (4 B/elem of HBM traffic instead of 6 B/elem); multiply still runs in f32.
    dim4 = 128
    gamma_d = init_values * jnp.ones((dim4,), dtype=jnp.float32)
    x_d = jax.random.normal(jax.random.PRNGKey(0), (8, 64, dim4),
                            dtype=jnp.float32).astype(jnp.bfloat16)
    y_d = layer_scale(x_d, gamma_d, out_dtype=jnp.bfloat16)
    jax.block_until_ready(y_d)
    ref_d = (x_d.astype(jnp.float32) * gamma_d).astype(jnp.bfloat16)
    assert y_d.dtype == jnp.bfloat16
    assert jnp.allclose(y_d.astype(jnp.float32), ref_d.astype(jnp.float32),
                        rtol=1e-2, atol=1e-8)

    print("KERNEL_OK")
</pallas_src>

<mosaic_0001>
module attributes {stable_mosaic.version = 11 : i64} {
  func.func @_layer_scale_kernel(%arg0: i32, %arg1: memref<1x128xf32, #tpu.memory_space<vmem>>, %arg2: memref<4x128xf32, #tpu.memory_space<vmem>>, %arg3: memref<4x128xf32, #tpu.memory_space<vmem>>) attributes {dimension_semantics = [#tpu.dimension_semantics<parallel>], iteration_bounds = array<i64: 1>, scalar_prefetch = 0 : i64, scratch_operands = 0 : i64, tpu.core_type = #tpu.core_type<tc>, window_params = [{pipeline_mode = #tpu.pipeline_mode<synchronous>, transform_indices = @transform_0, window_bounds = array<i64: 1, 128>}, {transform_indices = @transform_1, window_bounds = array<i64: 4, 128>}, {transform_indices = @transform_2, window_bounds = array<i64: 4, 128>}]} {
    %c0 = arith.constant 0 : index
    %c0_0 = arith.constant 0 : index
    %0 = vector.load %arg2[%c0, %c0_0] : memref<4x128xf32, #tpu.memory_space<vmem>>, vector<4x128xf32>
    %c0_1 = arith.constant 0 : index
    %c0_2 = arith.constant 0 : index
    %1 = vector.load %arg1[%c0_1, %c0_2] : memref<1x128xf32, #tpu.memory_space<vmem>>, vector<1x128xf32>
    %2 = vector.broadcast %1 : vector<1x128xf32> to vector<4x128xf32>
    %3 = arith.mulf %0, %2 : vector<4x128xf32>
    %c0_3 = arith.constant 0 : index
    %c0_4 = arith.constant 0 : index
    %4 = vector.load %arg3[%c0_3, %c0_4] : memref<4x128xf32, #tpu.memory_space<vmem>>, vector<4x128xf32>
    tpu.vector_store %arg3[%c0_3, %c0_4], %3 {strides = array<i32>} : memref<4x128xf32, #tpu.memory_space<vmem>>, vector<4x128xf32>,
    return
  }
  func.func @transform_0(%arg0: i32) -> (i32, i32) {
    %c0_i32 = arith.constant 0 : i32
    %c0_i32_0 = arith.constant 0 : i32
    %c0_i32_1 = arith.constant 0 : i32
    return %c0_i32, %c0_i32_0 : i32, i32
  }
  func.func @transform_1(%arg0: i32) -> (i32, i32) {
    %c0_i32 = arith.constant 0 : i32
    %c0_i32_0 = arith.constant 0 : i32
    return %arg0, %c0_i32 : i32, i32
  }
  func.func @transform_2(%arg0: i32) -> (i32, i32) {
    %c0_i32 = arith.constant 0 : i32
    %c0_i32_0 = arith.constant 0 : i32
    return %arg0, %c0_i32 : i32, i32
  }
}

</mosaic_0001>

<bundles_post_ra>
// kernel: tpu_custom_call.1
= control target key start
LH: loop header
LB: loop body
LE: loop exit
PB: predicated region body
PF: predicated region fallthrough
CT: control target
= control target key end

     0   :  { %7 = vsyncpa [#allocation3], 0  ;;  %s192_s0 = inlined_call_operand.hbm [shape: f32[1,128], index: 0, kind: input, shape index: {}]   ;;  %s193_s1 = inlined_call_operand.hbm [shape: f32[4,128], index: 1, kind: input, shape index: {}]   ;;  %s194_s2 = inlined_call_operand.hbm [shape: f32[4,128], index: 2, kind: output, shape index: {}]  }
   0x1   :  { %8 = vsyncpa [#allocation6], 0 }
   0x2   :  { %9 = vsyncpa [#allocation4], 0  ;;  %s138_s9 = smov [#allocation2]   ;;  %s139_s11 = smov [#allocation5]  }
   0x3   :  { %s16_s10 = sshll.u32 %s138_s9, 4  ;;  %s26_s12 = sshll.u32 %s139_s11, 4  ;;  %s17_s10 = int_to_ptr.vmem [resolvable:$true] %s16_s10  ;;  %s27_s12 = int_to_ptr.vmem [resolvable:$true] %s26_s12 }
   0x4   :  { %s66_s15 = scalar_lea.hbm %s192_s0, 16 }
   0x5   :  { %p67_p0 = scmp.ne.s32.totalorder %s192_s0, %s66_s15  ;;  %p70_p1 = scmp.lt.u32.totalorder %s66_s15, %s192_s0 }
   0x7   :  { %p72_p2 = pnand %p70_p1, %p67_p0 }
   0x9   :  { %75 = shalt.err (!%p72_p2)
}
   0xa   :  { %s76_s20 = scalar_lea.vmem %s17_s10, 16  ;;  %s80_s21 = scalar_lea.vmem %s17_s10, 32 }
   0xb   :  { %p77_p3 = scmp.ne.s32.totalorder %s17_s10, %s76_s20  ;;  %p81_p4 = scmp.lt.s32.totalorder %s17_s10, %s17_s10 }
   0xc   :  { %p82_p5 = scmp.lt.s32.totalorder %s80_s21, %s76_s20 }
   0xe   :  { %p83_p6 = por %p82_p5, %p81_p4 }
  0x10   :  { %p84_p7 = pnand %p83_p6, %p77_p3 }
  0x12   :  { %87 = shalt.err (!%p84_p7)
}
  0x13   :  { %19 = dma.hbm_to_vmem [thread:$0]  %s192_s0, 16, %s17_s10, [#allocation3]  }
  0x14   :  { %s88_s26 = scalar_lea.hbm %s193_s1, 64 }
  0x15   :  { %p89_p8 = scmp.ne.s32.totalorder %s193_s1, %s88_s26  ;;  %p92_p9 = scmp.lt.u32.totalorder %s88_s26, %s193_s1 }
  0x17   :  { %p94_p10 = pnand %p92_p9, %p89_p8 }
  0x19   :  { %97 = shalt.err (!%p94_p10)
}
  0x1a   :  { %s98_s3 = scalar_lea.vmem %s27_s12, 64  ;;  %p103_p12 = scmp.lt.s32.totalorder %s27_s12, %s27_s12 }
  0x1b   :  { %p99_p11 = scmp.ne.s32.totalorder %s27_s12, %s98_s3  ;;  %p104_p13 = scmp.lt.s32.totalorder %s98_s3, %s98_s3 }
  0x1d   :  { %p105_p0 = por %p104_p13, %p103_p12 }
  0x1f   :  { %p106_p1 = pnand %p105_p0, %p99_p11 }
  0x21   :  { %109 = shalt.err (!%p106_p1)
}
  0x22   :  { %29 = dma.hbm_to_vmem [thread:$0]  %s193_s1, 64, %s27_s12, [#allocation6]  }
  0x23   :  { %132 = dma.done.wait [#allocation3], 16  }
  0x24   :  { %133 = vsyncadd [#allocation3], 4294967280 }
  0x25   :  { %134 = dma.done.wait [#allocation6], 64  }
  0x26   :  { %135 = vsyncadd [#allocation6], 4294967232  ;;  %s140_s5 = smov [#allocation7]   ;;  %v36_v0 = vld [vmem:[#allocation5] sm:$0xf] }
  0x27   :  { %s52_s6 = sshll.u32 %s140_s5, 4  ;;  %v62_v1 = vld [vmem:[#allocation2] ss:$0 sm:$0xff]  ;;  %s53_s6 = int_to_ptr.vmem [resolvable:$true] %s52_s6 }
  0x28   :  { %v44_v2 = vmul.f32 %v62_v1, %v36_v0  ;;  %s110_s7 = scalar_lea.vmem %s53_s6, 64  ;;  %p115_p3 = scmp.lt.s32.totalorder %s53_s6, %s53_s6 }
  0x29   :  { %p111_p2 = scmp.ne.s32.totalorder %s53_s6, %s110_s7  ;;  %p116_p4 = scmp.lt.s32.totalorder %s110_s7, %s110_s7 }
  0x2a   :  { %45 = vst [vmem:[#allocation7] sm:$0xf] %v44_v2 }
  0x2b   :  { %p117_p5 = por %p116_p4, %p115_p3 }
  0x2d   :  { %p118_p6 = pnand %p117_p5, %p111_p2 }
  0x2f   :  { %121 = shalt.err (!%p118_p6)
}
  0x30   :  { %s122_s9 = scalar_lea.hbm %s194_s2, 64 }
  0x31   :  { %p123_p7 = scmp.ne.s32.totalorder %s194_s2, %s122_s9  ;;  %p126_p8 = scmp.lt.u32.totalorder %s122_s9, %s194_s2 }
  0x33   :  { %p128_p9 = pnand %p126_p8, %p123_p7 }
  0x35   :  { %131 = shalt.err (!%p128_p9)
}
  0x36   :  { %55 = dma.vmem_to_hbm [thread:$0]  %s53_s6, 64, %s194_s2, [#allocation4]  }
  0x37   :  { %136 = dma.done.wait [#allocation4], 64  }
  0x38   :  { %137 = vsyncadd [#allocation4], 4294967232 }
  0x39   :  { %59 = vsyncpa [#allocation3], 1 }
  0x3a   :  { %60 = vsyncpa [#allocation6], 1 }
  0x3b   :  { %61 = vsyncpa [#allocation4], 1 }

</bundles_post_ra>
